<compile_context>
chip_gen: v7x
topology: tpu7x:2x2x1
jax: 0.10.0
libtpu: 0.0.40
codegen_flags: <defaults>
</compile_context>

<pallas_src>
import functools

import jax
import jax.numpy as jnp
import numpy as np
from jax.experimental import pallas as pl
from jax.experimental.pallas import tpu as pltpu


def _vmem_capacity_bytes():
    try:
        info = pltpu.get_tpu_info()
        cap = getattr(info, "vmem_capacity_bytes", None)
        if cap:
            return int(cap)
    except Exception:
        pass
    return 64 * 1024 * 1024  # conservative default (v7x per-TC VMEM)


def _ca_fused_kernel(x_ref, w1_ref, b1_ref, w2_ref, b2_ref, o_ref, *, use_mxu):
    """Single-pass kernel: pool -> SE -> apply, one (Nb, C, HW) block per step."""
    x = x_ref[...]                                       # (Nb, C, HW), input dtype
    pooled = jnp.sum(x.astype(jnp.float32), axis=-1)     # (Nb, C); 1/HW folded into w1
    w1 = w1_ref[...]
    w2 = w2_ref[...]
    b1 = b1_ref[...]
    b2 = b2_ref[...]
    if use_mxu:
        # Weights shipped pre-transposed: w1 (C, Csq), w2 (Csq, C).
        mid = jnp.dot(pooled, w1, preferred_element_type=jnp.float32) + b1
        mid = jnp.maximum(mid, 0.0)
        att = jnp.dot(mid, w2, preferred_element_type=jnp.float32) + b2
    else:
        # VPU path for tiny C: broadcast-multiply + lane reduce. w1 (Csq, C), w2 (C, Csq).
        mid = jnp.sum(pooled[:, None, :] * w1[None, :, :], axis=-1) + b1
        mid = jnp.maximum(mid, 0.0)
        att = jnp.sum(mid[:, None, :] * w2[None, :, :], axis=-1) + b2
    att = jax.nn.sigmoid(att)                            # (Nb, C), f32
    # Keep att in f32 through the multiply; cast only the product.
    o_ref[...] = (x * att[:, :, None]).astype(o_ref.dtype)


def _ca_sum_kernel(x_ref, sum_ref):
    """Pass 1 of the two-pass path: per-channel spatial sums for a channel chunk."""
    sum_ref[...] = jnp.sum(x_ref[...].astype(jnp.float32), axis=-1, keepdims=True)


def _ca_apply_kernel(att_ref, x_ref, o_ref):
    """Pass 2 of the two-pass path: apply precomputed attention to a channel chunk."""
    o_ref[...] = (x_ref[...] * att_ref[...]).astype(o_ref.dtype)


def channel_attention(x, w1, b1, w2, b2, *, use_mxu=None, force_two_pass=False):
    """RCAN ChannelAttention forward.

    x: (N, C, H, W); w1: (Csq, C); b1: (Csq,); w2: (C, Csq); b2: (C,).
    """
    N, C, H, W = x.shape
    HW = H * W
    Csq = w1.shape[0]
    itemsize = jnp.dtype(x.dtype).itemsize

    if use_mxu is None:
        use_mxu = C >= 128   # VPU broadcast path only pays for small C

    vmem_cap = _vmem_capacity_bytes()
    usable = int(vmem_cap * 0.6)                       # headroom for compiler scratch
    block_cap = min(16 * 1024 * 1024, usable // 4)     # in+out double-buffered = 4 blocks

    xf = x.reshape(N, C, HW)                           # metadata-only reshape
    per_batch_bytes = C * HW * itemsize

    two_pass = force_two_pass or (per_batch_bytes > block_cap)

    if not two_pass:
        # ---------- single fused pass: one HBM read + one HBM write of x ----------
        # Fold the 1/HW of the mean into w1; ship biases as lane-dense rows.
        if use_mxu:
            w1k = (w1.astype(jnp.float32) * (1.0 / HW)).T   # (C, Csq)
            w2k = w2.astype(jnp.float32).T                  # (Csq, C)
        else:
            w1k = w1.astype(jnp.float32) * (1.0 / HW)       # (Csq, C)
            w2k = w2.astype(jnp.float32)                    # (C, Csq)
        b1r = b1.reshape(1, Csq).astype(jnp.float32)
        b2r = b2.reshape(1, C).astype(jnp.float32)
        param_bytes = 4 * (w1k.size + b1r.size + w2k.size + b2r.size)

        Nb = max(1, min(N, block_cap // per_batch_bytes))
        if N >= 2:
            Nb = min(Nb, max(1, N // 2))   # keep >= 2 grid steps (v7x has 2 TCs)
        grid = (pl.cdiv(N, Nb),)           # non-divisor Nb OK: per-batch math independent

        block_bytes = Nb * per_batch_bytes
        vmem_limit = min(int(vmem_cap * 0.9),
                         max(8 * 1024 * 1024,
                             int((4 * block_bytes + 2 * param_bytes) * 1.3)))

        cost = pl.CostEstimate(
            flops=int(2 * N * C * HW + 4 * N * C * Csq),
            transcendentals=int(N * C),
            bytes_accessed=int(2 * N * C * HW * itemsize + param_bytes),
        )

        out = pl.pallas_call(
            functools.partial(_ca_fused_kernel, use_mxu=use_mxu),
            out_shape=jax.ShapeDtypeStruct((N, C, HW), x.dtype),
            grid=grid,
            in_specs=[
                pl.BlockSpec((Nb, C, HW), lambda n: (n, 0, 0)),
                pl.BlockSpec(w1k.shape, lambda n: (0, 0)),
                pl.BlockSpec(b1r.shape, lambda n: (0, 0)),
                pl.BlockSpec(w2k.shape, lambda n: (0, 0)),
                pl.BlockSpec(b2r.shape, lambda n: (0, 0)),
            ],
            out_specs=pl.BlockSpec((Nb, C, HW), lambda n: (n, 0, 0)),
            compiler_params=pltpu.CompilerParams(
                dimension_semantics=("parallel",),
                vmem_limit_bytes=vmem_limit,
            ),
            cost_estimate=cost,
        )(xf, w1k, b1r, w2k, b2r)
        return out.reshape(N, C, H, W)

    # ---------- two-pass fallback: channel-tiled blocks that keep the full HW ----------
    # Channel chunk: multiple of 8 (or == C) under the block cap. Full HW stays in
    # lanes, so per-channel sums never need spatial masking and partial channel-edge
    # blocks are harmless (each channel's sum lives entirely in one block).
    if C >= 8:
        ct_cap = max(1, block_cap // max(1, HW * itemsize))
        Ct = max(8, (min(C, ct_cap) // 8) * 8)
        if Ct >= C:
            Ct = C
    else:
        Ct = C

    grid2 = (N, pl.cdiv(C, Ct))
    blk = Ct * HW * itemsize
    vmem_limit = min(int(vmem_cap * 0.9), max(8 * 1024 * 1024, int(4 * blk * 1.3)))

    # Pass 1: per-channel spatial sums.
    sums = pl.pallas_call(
        _ca_sum_kernel,
        out_shape=jax.ShapeDtypeStruct((N, C, 1), jnp.float32),
        grid=grid2,
        in_specs=[pl.BlockSpec((1, Ct, HW), lambda n, c: (n, c, 0))],
        out_specs=pl.BlockSpec((1, Ct, 1), lambda n, c: (n, c, 0)),
        compiler_params=pltpu.CompilerParams(
            dimension_semantics=("parallel", "parallel"),
            vmem_limit_bytes=vmem_limit,
        ),
        cost_estimate=pl.CostEstimate(
            flops=int(N * C * HW),
            transcendentals=0,
            bytes_accessed=int(N * C * HW * itemsize),
        ),
    )(xf)

    # Tiny (N, C) squeeze-excite: plain XLA is negligible next to the HBM passes.
    pooled = sums[:, :, 0] * (1.0 / HW)
    mid = jnp.maximum(pooled @ w1.astype(jnp.float32).T + b1.astype(jnp.float32), 0.0)
    att = jax.nn.sigmoid(mid @ w2.astype(jnp.float32).T + b2.astype(jnp.float32))
    att = att[:, :, None].astype(jnp.float32)          # (N, C, 1)

    # Pass 2: apply x * att (second HBM read of x + one write).
    out = pl.pallas_call(
        _ca_apply_kernel,
        out_shape=jax.ShapeDtypeStruct((N, C, HW), x.dtype),
        grid=grid2,
        in_specs=[
            pl.BlockSpec((1, Ct, 1), lambda n, c: (n, c, 0)),
            pl.BlockSpec((1, Ct, HW), lambda n, c: (n, c, 0)),
        ],
        out_specs=pl.BlockSpec((1, Ct, HW), lambda n, c: (n, c, 0)),
        compiler_params=pltpu.CompilerParams(
            dimension_semantics=("parallel", "parallel"),
            vmem_limit_bytes=vmem_limit,
        ),
        cost_estimate=pl.CostEstimate(
            flops=int(N * C * HW),
            transcendentals=0,
            bytes_accessed=int(2 * N * C * HW * itemsize),
        ),
    )(att, xf)
    return out.reshape(N, C, H, W)


def channel_attention_ref(x, w1, b1, w2, b2):
    pooled = jnp.mean(x, axis=(2, 3), keepdims=True)                     # (N, C, 1, 1)
    mid = jnp.einsum('nchw,oc->nohw', pooled, w1) + b1[None, :, None, None]
    mid = jax.nn.relu(mid)
    att = jnp.einsum('nchw,oc->nohw', mid, w2) + b2[None, :, None, None]
    att = jax.nn.sigmoid(att)
    return x * att


if __name__ == "__main__":
    def make_case(key, N, C, H, W, squeeze):
        Csq = max(1, C // squeeze)
        kx, kw1, kb1, kw2, kb2 = jax.random.split(key, 5)
        x = jax.random.normal(kx, (N, C, H, W), dtype=jnp.float32)
        w1 = jax.random.normal(kw1, (Csq, C), dtype=jnp.float32) * 0.1
        b1 = jax.random.normal(kb1, (Csq,), dtype=jnp.float32) * 0.1
        w2 = jax.random.normal(kw2, (C, Csq), dtype=jnp.float32) * 0.1
        b2 = jax.random.normal(kb2, (C,), dtype=jnp.float32) * 0.1
        return x, w1, b1, w2, b2

    key = jax.random.PRNGKey(0)
    k1, k2 = jax.random.split(key)

    # Cases cover: fused VPU path, fused MXU-projection path, two-pass fallback,
    # and non-multiple-of-128 spatial size / non-multiple-of-8 channel count.
    cases = [
        (make_case(k1, 2, 16, 16, 16, 4), dict()),
        (make_case(k1, 2, 16, 16, 16, 4), dict(use_mxu=True)),
        (make_case(k1, 2, 16, 16, 16, 4), dict(force_two_pass=True)),
        (make_case(k2, 2, 20, 15, 15, 4), dict()),
        (make_case(k2, 2, 20, 15, 15, 4), dict(force_two_pass=True)),
    ]

    for args, kwargs in cases:
        out = jax.block_until_ready(channel_attention(*args, **kwargs))
        ref = channel_attention_ref(*args)
        np.testing.assert_allclose(np.asarray(out), np.asarray(ref),
                                   rtol=1e-5, atol=1e-5)

    print("KERNEL_OK")
</pallas_src>

<mosaic_0001>
module attributes {stable_mosaic.version = 11 : i64} {
  func.func @_ca_fused_kernel(%arg0: i32, %arg1: memref<1x16x256xf32, #tpu.memory_space<vmem>>, %arg2: memref<4x16xf32, #tpu.memory_space<vmem>>, %arg3: memref<1x4xf32, #tpu.memory_space<vmem>>, %arg4: memref<16x4xf32, #tpu.memory_space<vmem>>, %arg5: memref<1x16xf32, #tpu.memory_space<vmem>>, %arg6: memref<1x16x256xf32, #tpu.memory_space<vmem>>) attributes {dimension_semantics = [#tpu.dimension_semantics<parallel>], iteration_bounds = array<i64: 2>, scalar_prefetch = 0 : i64, scratch_operands = 0 : i64, tpu.core_type = #tpu.core_type<tc>, window_params = [{transform_indices = @transform_0, window_bounds = array<i64: 1, 16, 256>}, {pipeline_mode = #tpu.pipeline_mode<synchronous>, transform_indices = @transform_1, window_bounds = array<i64: 4, 16>}, {pipeline_mode = #tpu.pipeline_mode<synchronous>, transform_indices = @transform_2, window_bounds = array<i64: 1, 4>}, {pipeline_mode = #tpu.pipeline_mode<synchronous>, transform_indices = @transform_3, window_bounds = array<i64: 16, 4>}, {pipeline_mode = #tpu.pipeline_mode<synchronous>, transform_indices = @transform_4, window_bounds = array<i64: 1, 16>}, {transform_indices = @transform_5, window_bounds = array<i64: 1, 16, 256>}]} {
    %c0 = arith.constant 0 : index
    %c0_0 = arith.constant 0 : index
    %c0_1 = arith.constant 0 : index
    %0 = vector.load %arg1[%c0, %c0_0, %c0_1] : memref<1x16x256xf32, #tpu.memory_space<vmem>>, vector<1x16x256xf32>
    %cst = arith.constant dense<0.000000e+00> : vector<1x16xf32>
    %1 = vector.multi_reduction <add>, %0, %cst [2] : vector<1x16x256xf32> to vector<1x16xf32>
    %c0_2 = arith.constant 0 : index
    %c0_3 = arith.constant 0 : index
    %2 = vector.load %arg2[%c0_2, %c0_3] : memref<4x16xf32, #tpu.memory_space<vmem>>, vector<4x16xf32>
    %c0_4 = arith.constant 0 : index
    %c0_5 = arith.constant 0 : index
    %3 = vector.load %arg4[%c0_4, %c0_5] : memref<16x4xf32, #tpu.memory_space<vmem>>, vector<16x4xf32>
    %c0_6 = arith.constant 0 : index
    %c0_7 = arith.constant 0 : index
    %4 = vector.load %arg3[%c0_6, %c0_7] : memref<1x4xf32, #tpu.memory_space<vmem>>, vector<1x4xf32>
    %c0_8 = arith.constant 0 : index
    %c0_9 = arith.constant 0 : index
    %5 = vector.load %arg5[%c0_8, %c0_9] : memref<1x16xf32, #tpu.memory_space<vmem>>, vector<1x16xf32>
    %6 = vector.shape_cast %1 : vector<1x16xf32> to vector<1x1x16xf32>
    %7 = vector.shape_cast %2 : vector<4x16xf32> to vector<1x4x16xf32>
    %8 = vector.broadcast %6 : vector<1x1x16xf32> to vector<1x4x16xf32>
    %9 = arith.mulf %8, %7 : vector<1x4x16xf32>
    %cst_10 = arith.constant dense<0.000000e+00> : vector<1x4xf32>
    %10 = vector.multi_reduction <add>, %9, %cst_10 [2] : vector<1x4x16xf32> to vector<1x4xf32>
    %11 = arith.addf %10, %4 : vector<1x4xf32>
    %cst_11 = arith.constant 0.000000e+00 : f32
    %12 = vector.broadcast %cst_11 : f32 to vector<1x4xf32>
    %13 = arith.maximumf %11, %12 : vector<1x4xf32>
    %14 = vector.shape_cast %13 : vector<1x4xf32> to vector<1x1x4xf32>
    %15 = vector.shape_cast %3 : vector<16x4xf32> to vector<1x16x4xf32>
    %16 = vector.broadcast %14 : vector<1x1x4xf32> to vector<1x16x4xf32>
    %17 = arith.mulf %16, %15 : vector<1x16x4xf32>
    %cst_12 = arith.constant dense<0.000000e+00> : vector<1x16xf32>
    %18 = vector.multi_reduction <add>, %17, %cst_12 [2] : vector<1x16x4xf32> to vector<1x16xf32>
    %19 = arith.addf %18, %5 : vector<1x16xf32>
    %20 = arith.negf %19 : vector<1x16xf32>
    %21 = math.exp %20 : vector<1x16xf32>
    %cst_13 = arith.constant 1.000000e+00 : f32
    %22 = vector.broadcast %cst_13 : f32 to vector<1x16xf32>
    %23 = arith.addf %22, %21 : vector<1x16xf32>
    %24 = arith.divf %22, %23 : vector<1x16xf32>
    %25 = vector.shape_cast %24 : vector<1x16xf32> to vector<1x16x1xf32>
    %26 = vector.broadcast %25 : vector<1x16x1xf32> to vector<1x16x256xf32>
    %27 = arith.mulf %0, %26 : vector<1x16x256xf32>
    %c0_14 = arith.constant 0 : index
    %c0_15 = arith.constant 0 : index
    %c0_16 = arith.constant 0 : index
    %28 = vector.load %arg6[%c0_14, %c0_15, %c0_16] : memref<1x16x256xf32, #tpu.memory_space<vmem>>, vector<1x16x256xf32>
    tpu.vector_store %arg6[%c0_14, %c0_15, %c0_16], %27 {strides = array<i32>} : memref<1x16x256xf32, #tpu.memory_space<vmem>>, vector<1x16x256xf32>,
    return
  }
  func.func @transform_0(%arg0: i32) -> (i32, i32, i32) {
    %c0_i32 = arith.constant 0 : i32
    %c0_i32_0 = arith.constant 0 : i32
    %c0_i32_1 = arith.constant 0 : i32
    return %arg0, %c0_i32, %c0_i32_0 : i32, i32, i32
  }
  func.func @transform_1(%arg0: i32) -> (i32, i32) {
    %c0_i32 = arith.constant 0 : i32
    %c0_i32_0 = arith.constant 0 : i32
    %c0_i32_1 = arith.constant 0 : i32
    return %c0_i32, %c0_i32_0 : i32, i32
  }
  func.func @transform_2(%arg0: i32) -> (i32, i32) {
    %c0_i32 = arith.constant 0 : i32
    %c0_i32_0 = arith.constant 0 : i32
    %c0_i32_1 = arith.constant 0 : i32
    return %c0_i32, %c0_i32_0 : i32, i32
  }
  func.func @transform_3(%arg0: i32) -> (i32, i32) {
    %c0_i32 = arith.constant 0 : i32
    %c0_i32_0 = arith.constant 0 : i32
    %c0_i32_1 = arith.constant 0 : i32
    return %c0_i32, %c0_i32_0 : i32, i32
  }
  func.func @transform_4(%arg0: i32) -> (i32, i32) {
    %c0_i32 = arith.constant 0 : i32
    %c0_i32_0 = arith.constant 0 : i32
    %c0_i32_1 = arith.constant 0 : i32
    return %c0_i32, %c0_i32_0 : i32, i32
  }
  func.func @transform_5(%arg0: i32) -> (i32, i32, i32) {
    %c0_i32 = arith.constant 0 : i32
    %c0_i32_0 = arith.constant 0 : i32
    %c0_i32_1 = arith.constant 0 : i32
    return %arg0, %c0_i32, %c0_i32_0 : i32, i32, i32
  }
}

</mosaic_0001>

<bundles_post_ra>
// kernel: tpu_custom_call.1
= control target key start
LH: loop header
LB: loop body
LE: loop exit
PB: predicated region body
PF: predicated region fallthrough
CT: control target
= control target key end

     0   :  { %10 = vsyncpa [#allocation3], 0  ;;  %s1324_s0 = inlined_call_operand.hbm [shape: f32[2,16,256], index: 0, kind: input, shape index: {}]   ;;  %s1325_s1 = inlined_call_operand.vmem [shape: f32[4,16], index: 1, kind: input, shape index: {}]   ;;  %s1326_s2 = inlined_call_operand.vmem [shape: f32[1,4], index: 2, kind: input, shape index: {}]   ;;  %s1327_s3 = inlined_call_operand.vmem [shape: f32[16,4], index: 3, kind: input, shape index: {}]   ;;  %s1328_s4 = inlined_call_operand.vmem [shape: f32[1,16], index: 4, kind: input, shape index: {}]   ;;  %s1329_s5 = inlined_call_operand.hbm [shape: f32[2,16,256], index: 5, kind: output, shape index: {}]  }
   0x1   :  { %12 = vsyncpa [#allocation3 + $0x1], 0 }
   0x2   :  { %13 = vsyncpa [#allocation4], 0 }
   0x3   :  { %15 = vsyncpa [#allocation4 + $0x1], 0  ;;  %s1063_s18 = smov 0   ;;  %s1065_s19 = smov 0  }
   0x4   :  { %s1067_s20 = smov 0   ;;  %s1069_s21 = smov 0  }
   0x5 LB: > { %s1084_s22 = sadd.s32 4294967295, %s1024_s21   ;;  %s847_s23 = sadd.s32 4294967294, %s1024_s21   ;;  %s1024_s21 = sphi %s1069_s21, %s1342_s21   ;;  %s1020_s20 = sphi %s1067_s20, %s1341_s20   ;;  %s1016_s19 = sphi %s1065_s19, %s1340_s19   ;;  %s1012_s18 = sphi %s1063_s18, %s1339_s18  }
   0x6   : > { %s1088_s24 = sadd.s32 1, %s1024_s21   ;;  %s28_s25 = sadd.s32 1, %s1020_s20 }
   0x7   : > { %s25_s26 = ssub.s32 %s1024_s21, %s1088_s24  ;;  %p35_p0 = scmp.ne.s32.totalorder %s1020_s20, %s1016_s19 }
   0x8   : > { %p26_p1 = scmp.eq.s32.totalorder %s25_s26, 0  ;;  %p36_p2 = scmp.eq.s32.totalorder %s1024_s21, 0 }
   0x9   : > { %p41_p3 = scmp.ne.s32.totalorder %s1016_s19, %s1012_s18  ;;  %p42_p4 = scmp.eq.s32.totalorder %s1084_s22, 0 }
   0xa   : > { %s1100_s27 = scalar_select %p26_p1, %s1020_s20, %s28_s25  }
   0xb   : > { %p1102_p5 = por %p36_p2, %p35_p0  ;;  %p1106_p6 = por %p42_p4, %p41_p3 }
   0xc   : > { %p149_p7 = scmp.eq.s32.totalorder %s1084_s22, 1  ;;  %p155_p8 = scmp.eq.s32.totalorder %s847_s23, 1 }
   0xd   : > { %p879_p10 = scmp.lt.s32.totalorder %s1024_s21, 2  ;;  %s187_s7 = sand.u32 1, %s1020_s20  }
   0xe   : > { %p1113_p11 = por %p149_p7, %p35_p0  ;;  %p1117_p12 = por %p155_p8, %p41_p3 }
   0xf   : > { %s865_s8 = sshll.u32 %s1024_s21, 9  ;;  %s850_s9 = sshll.u32 %s187_s7, 5 }
  0x10   : > { %s1333_s30 = scalar_select %p1113_p11, 1, 0 }
  0x11   : > { %s1334_s6 = scalar_select %p1117_p12, 1, 0 }
  0x12   : > { %s1126_s12 = scalar_lea.hbm %s1324_s0, %s865_s8  ;;  %s191_s13 = scalar_lea.vmem [#allocation2], %s850_s9 }
  0x13   : > { %s198_s14 = sshll.u32 %s191_s13, 4  ;;  %p1130_p13 = pnand %p879_p10, %p1102_p5  ;;  %s1134_s14 = int_to_ptr.vmem [resolvable:$true] %s198_s14 }
  0x14   : > { %s1136_s16 = scalar_lea.sflag [#allocation3], %s187_s7  ;;  %s928_s17 = scalar_lea.hbm %s1126_s12, 512 }
  0x15   : > { %p929_p0 = scmp.ne.s32.totalorder %s1126_s12, %s928_s17  ;;  %p930_p1 = pneg %p1130_p13 }
  0x16   : > { %s933_s26 = scalar_lea.hbm %s1324_s0, 1024  ;;  %p934_p4 = scmp.lt.u32.totalorder %s1126_s12, %s1324_s0 }
  0x17   : > { %p931_p2 = pnand %p930_p1, %p929_p0  ;;  %p935_p5 = scmp.lt.u32.totalorder %s933_s26, %s928_s17 }
  0x18   : > { %p937_p8 = scmp.lt.u32.totalorder %s928_s17, %s1126_s12 }
  0x19   : > { %p932_p3 = pneg %p931_p2  ;;  %p936_p7 = por %p935_p5, %p934_p4 }
  0x1b   : > { %p938_p10 = por %p937_p8, %p936_p7 }
  0x1d   : > { %p939_p9 = pnand %p938_p10, %p932_p3 }
  0x1f   : > { %942 = shalt.err (!%p939_p9)
}
  0x20   : > { %s943_s7 = scalar_lea.vmem %s1134_s14, 512  ;;  %s1026_s9 = smov [#allocation2]  }
  0x21   : > { %p944_p0 = scmp.ne.s32.totalorder %s1134_s14, %s943_s7  ;;  %s948_s10 = sshll.u32 %s1026_s9, 4  ;;  %s949_s10 = int_to_ptr.vmem [resolvable:$false] %s948_s10 }
  0x22   : > { %s950_s11 = scalar_lea.vmem %s949_s10, 1024  ;;  %p951_p11 = scmp.lt.s32.totalorder %s1134_s14, %s949_s10 }
  0x23   : > { %p946_p2 = pnand %p944_p0, %p930_p1  ;;  %p952_p4 = scmp.lt.s32.totalorder %s950_s11, %s943_s7 }
  0x25   : > { %p947_p12 = pneg %p946_p2  ;;  %p953_p5 = por %p952_p4, %p951_p11 }
  0x27   : > { %p954_p7 = pnand %p953_p5, %p947_p12 }
  0x29   : > { %957 = shalt.err (!%p954_p7)
}
  0x2a   : > { %s1027_s13 = smov 256   ;;  %s1028_s17 = smov 16  }
  0x2b   : > { %874 = dma.hbm_to_vmem [thread:$0]  (!%p1130_p13), %s1126_s12, 512, %s1134_s14, %s1136_s16, %s1027_s13, %s1027_s13, %s1028_s17  }
  0x2c   : > { %p853_p9 = scmp.ge.s32.totalorder %s1024_s21, 1  ;;  %p206_p1 = scmp.lt.s32.totalorder %s1024_s21, 3 }
  0x2e   : > { %p207_p3 = pnand %p853_p9, %p206_p1 }
  0x2f   : > { %s1167_s23 = sand.u32 (!%p207_p3), 1, %s1016_s19  }
  0x30   : > { %210 = sbr.rel (%p207_p3) target bundleno = 984 (0x3d8), region = 40  ;;  %s854_s25 = sshll.u32 (!%p207_p3), %s1167_s23, 5 }
  0x31   : > { %s213_s26 = scalar_lea.sflag (!%p207_p3), [#allocation3], %s1167_s23  ;;  %s216_s28 = scalar_lea.vmem (!%p207_p3), [#allocation2], %s854_s25 }
  0x37   : > { %1003 = dma.done.wait (%p1106_p6), %s213_s26, 512  }
  0x38   : > { %1005 = vsyncadd (%p1106_p6), %s213_s26, 4294966784  ;;  %v259_v0 = vlaneseq  ;;  %v1183_v3 = vld [vmem:[%s216_s28] sm:$0xff]  ;;  %v1185_v4 = vld [vmem:[%s216_s28 + $0x8] sm:$0xff]  ;;  %v1029_v16 = vmov 0   ;;  %vm362_vm0 = vcmask 130112   ;;  %vm391_vm1 = vcmask 1041409  }
  0x39   : > { %v1187_v5 = vld [vmem:[%s216_s28 + $0x10] sm:$0xff]  ;;  %v247_v6 = vadd.f32 %v1185_v4, %v1183_v3  ;;  %v1191_v7 = vld [vmem:[%s216_s28 + $0x18] sm:$0xff]  ;;  %v253_v8 = vld [vmem:[%s1325_s1] sm:$0xf]  ;;  %918 = vset.pattern.permute.xlu1 %v1029_v16  ;;  %919 = vset.pattern.permute.xlu0 %v1029_v16  ;;  %vm393_vm2 = vcmask 1042434   ;;  %vm395_vm3 = vcmask 1043459  }
  0x3a   : > { %v1178_v1 = vshrl.u32 %v259_v0, 7  ;;  %v250_v10 = vadd.f32 %v1191_v7, %v1187_v5  ;;  %v1205_v31 = vld [vmem:[%s1327_s3 + $0x8] sm:$0xff]  ;;  %v856_v40 = vld [vmem:[%s1326_s2] ss:$0 sm:$0xff]  ;;  %v352_v60 = vand.u32 127, %v259_v0  ;;  %vm398_vm4 = vcmask 125952  }
  0x3b   : > { %248 = vadd.xlane.f32.xlu0 %v247_v6  ;;  %v254_v41 = vld [vmem:[%s1327_s3] sm:$0xff]  ;;  %vm690_vm5 = vcmask 1044484   ;;  %vm692_vm6 = vcmask 1045509   ;;  %vm694_vm7 = vcmask 1046534   ;;  %vm696_vm8 = vcmask 1047559   ;;  %s242_s13 = scalar_lea.vmem [#allocation5], %s854_s25 }
  0x3c   : > { %v1181_v2 = vsub.s32 0, %v1178_v1  ;;  %v272_v11 = vsub.s32 1, %v1178_v1  ;;  %v283_v13 = vsub.s32 2, %v1178_v1  ;;  %v294_v15 = vsub.s32 3, %v1178_v1  ;;  %s774_s17 = sshll.u32 %s242_s13, 4  ;;  %s866_s26 = sshll.u32 %s1084_s22, 9  ;;  %s1271_s17 = int_to_ptr.vmem [resolvable:$true] %s774_s17 }
  0x3d   : > { %v459_v35 = vsub.s32 6, %v1178_v1  ;;  %v445_v49 = vsub.s32 4, %v1178_v1  ;;  %v452_v52 = vsub.s32 5, %v1178_v1  ;;  %v466_v56 = vsub.s32 7, %v1178_v1  ;;  %s1278_s12 = scalar_lea.hbm %s1329_s5, %s866_s26  ;;  %s761_s22 = scalar_lea.sflag [#allocation4], %s1167_s23 }
  0x3e   : > { %v262_v9 = vrot.slane %v253_v8, %v1181_v2  ;;  %v273_v12 = vrot.slane %v253_v8, %v272_v11  ;;  %v284_v14 = vrot.slane %v253_v8, %v283_v13  ;;  %v295_v17 = vrot.slane %v253_v8, %v294_v15  ;;  %s958_s25 = scalar_lea.vmem %s1271_s17, 512  ;;  %p1336_p11 = scmp.ne.s32.totalorder %s1333_s30, 0 }
  0x3f   : > { %251 = vadd.xlane.f32.xlu0 %v250_v10  ;;  %v495_v34 = vrot.slane %v1205_v31, %v294_v15  ;;  %v516_v38 = vrot.slane %v1205_v31, %v459_v35  ;;  %v418_v42 = vrot.slane %v254_v41, %v1181_v2  ;;  %v425_v43 = vrot.slane %v254_v41, %v272_v11  ;;  %p959_p6 = scmp.ne.s32.totalorder %s1271_s17, %s958_s25  ;;  %s1030_s14 = smov [#allocation5]  }
  0x40   : > { %264 = vbcast.lane.b32.xlu1 %v262_v9, 256  ;;  %v474_v44 = vrot.slane %v1205_v31, %v1181_v2  ;;  %v481_v45 = vrot.slane %v1205_v31, %v272_v11  ;;  %v432_v46 = vrot.slane %v254_v41, %v283_v13  ;;  %v488_v47 = vrot.slane %v1205_v31, %v283_v13  ;;  %s962_s15 = sshll.u32 %s1030_s14, 4  ;;  %s963_s15 = int_to_ptr.vmem [resolvable:$false] %s962_s15 }
  0x41   : > { %v439_v48 = vrot.slane %v254_v41, %v294_v15  ;;  %v446_v50 = vrot.slane %v254_v41, %v445_v49  ;;  %v502_v51 = vrot.slane %v1205_v31, %v445_v49  ;;  %v453_v53 = vrot.slane %v254_v41, %v452_v52  ;;  %p960_p12 = pnand %p959_p6, %p1336_p11  ;;  %s964_s16 = scalar_lea.vmem %s963_s15, 1024 }
  0x42   : > { %v509_v54 = vrot.slane %v1205_v31, %v452_v52  ;;  %v460_v55 = vrot.slane %v254_v41, %v459_v35  ;;  %v467_v57 = vrot.slane %v254_v41, %v466_v56  ;;  %v357_v62 = vadd.s32 4294967288, %v352_v60  ;;  %p965_p8 = scmp.lt.s32.totalorder %s1271_s17, %s963_s15  ;;  %p966_p10 = scmp.lt.s32.totalorder %s964_s16, %s958_s25 }
  0x43   : > { %v1229_v8 = vsub.s32 %v352_v60, %v1178_v1  ;;  %vm707_vm9 = vcmask 31744   ;;  %p961_p13 = pneg %p960_p12 }
  0x44   : > { %268 = vbcast.lane.b32.xlu1 %v262_v9, 264  ;;  %v360_v6 = vsub.s32 %v357_v62, %v1178_v1  ;;  %p967_p0 = por %p966_p10, %p965_p8 }
  0x46   : > { %p968_p2 = pnand %p967_p0, %p961_p13 }
  0x48   : > { %279 = vbcast.lane.b32.xlu1 %v273_v12, 264 }
  0x4c   : > { %286 = vbcast.lane.b32.xlu1 %v284_v14, 256 }
  0x50   : > { %290 = vbcast.lane.b32.xlu1 %v284_v14, 264 }
  0x54   : > { %297 = vbcast.lane.b32.xlu1 %v295_v17, 256 }
  0x55   : > { %275 = vbcast.lane.b32.xlu0 %v273_v12, 256 }
  0x58   : > { %301 = vbcast.lane.b32.xlu1 %v295_v17, 264 }
  0xb2   : > { %v265_v18 = vpop.permute.xlu1 %264 }
  0xb6   : > { %v269_v19 = vpop.permute.xlu1 %268 }
  0xba   : > { %v280_v20 = vpop.permute.xlu1 %279 }
  0xbe   : > { %v287_v21 = vpop.permute.xlu1 %286 }
  0xc2   : > { %v291_v24 = vpop.permute.xlu1 %290 }
  0xc6   : > { %v298_v30 = vpop.permute.xlu1 %297 }
  0xc8   : > { %v249_v22 = vpop.xlane.xlu0 %248 }
  0xc9   : > { %v311_v23 = vmul.f32 %v265_v18, %v249_v22  ;;  %v315_v29 = vmul.f32 %v287_v21, %v249_v22  ;;  %v317_v32 = vmul.f32 %v298_v30, %v249_v22 }
  0xca   : > { %v302_v37 = vpop.permute.xlu1 %301 }
  0xcb   : > { %328 = vperm.xlu1 %918, %v311_v23  }
  0xcc   : > { %v252_v25 = vpop.xlane.xlu0 %251 }
  0xcd   : > { %v312_v26 = vmul.f32 %v269_v19, %v252_v25  ;;  %v314_v33 = vmul.f32 %v280_v20, %v252_v25  ;;  %v316_v36 = vmul.f32 %v291_v24, %v252_v25  ;;  %v318_v39 = vmul.f32 %v302_v37, %v252_v25 }
  0xcf   : > { %331 = vperm.xlu0 %919, %v312_v26   ;;  %v523_v26 = vrot.slane %v1205_v31, %v466_v56 }
  0xd0   : > { %v276_v27 = vpop.permute.xlu0 %275 }
  0xd1   : > { %v313_v28 = vmul.f32 %v276_v27, %v249_v22 }
  0xd3   : > { %340 = vperm.xlu0 %919, %v315_v29   ;;  %334 = vperm.xlu1 %918, %v313_v28  }
  0xd7   : > { %346 = vperm.xlu0 %919, %v317_v32   ;;  %337 = vperm.xlu1 %918, %v314_v33  }
  0xdb   : > { %343 = vperm.xlu1 %918, %v316_v36   ;;  %497 = vbcast.lane.b32.xlu0 %v495_v34, 256 }
  0xdf   : > { %349 = vperm.xlu1 %918, %v318_v39   ;;  %518 = vbcast.lane.b32.xlu0 %v516_v38, 256 }
  0xe3   : > { %408 = vbcast.lane.b32.xlu1 %v856_v40, 256 }
  0xe7   : > { %420 = vbcast.lane.b32.xlu1 %v418_v42, 256 }
  0xeb   : > { %427 = vbcast.lane.b32.xlu1 %v425_v43, 256 }
  0xef   : > { %476 = vbcast.lane.b32.xlu1 %v474_v44, 256 }
  0xf3   : > { %483 = vbcast.lane.b32.xlu1 %v481_v45, 256 }
  0xf7   : > { %434 = vbcast.lane.b32.xlu1 %v432_v46, 256 }
  0xfb   : > { %490 = vbcast.lane.b32.xlu1 %v488_v47, 256 }
  0xff   : > { %441 = vbcast.lane.b32.xlu1 %v439_v48, 256 }
 0x103   : > { %448 = vbcast.lane.b32.xlu1 %v446_v50, 256 }
 0x107   : > { %504 = vbcast.lane.b32.xlu1 %v502_v51, 256 }
 0x10b   : > { %455 = vbcast.lane.b32.xlu1 %v453_v53, 256 }
 0x10f   : > { %511 = vbcast.lane.b32.xlu1 %v509_v54, 256 }
 0x113   : > { %462 = vbcast.lane.b32.xlu1 %v460_v55, 256 }
 0x117   : > { %469 = vbcast.lane.b32.xlu1 %v467_v57, 256 }
 0x14a   : > { %v329_v58 = vpop.permute.xlu1 %328 }
 0x14b   : > { %v356_v0 = vrot.slane %v329_v58, %v1229_v8 }
 0x14e   : > { %v332_v59 = vpop.permute.xlu0 %331 }
 0x14f   : > { %v361_v11 = vrot.slane %v332_v59, %v360_v6 }
 0x151   : > { %v363_v19 = vsel %vm362_vm0, %v361_v11, %v356_v0 }
 0x152   : > { %v335_v61 = vpop.permute.xlu1 %334  ;;  %v341_v63 = vpop.permute.xlu0 %340 }
 0x153   : > { %v367_v12 = vrot.slane %v335_v61, %v1229_v8  ;;  %v376_v14 = vrot.slane %v341_v63, %v1229_v8 }
 0x156   : > { %v338_v2 = vpop.permute.xlu1 %337  ;;  %v347_v15 = vpop.permute.xlu0 %346 }
 0x157   : > { %v371_v9 = vrot.slane %v338_v2, %v360_v6  ;;  %v385_v1 = vrot.slane %v347_v15, %v1229_v8 }
 0x159   : > { %v372_v16 = vsel %vm362_vm0, %v371_v9, %v367_v12 }
 0x15a   : > { %v344_v10 = vpop.permute.xlu1 %343  ;;  %v392_v21 = vsel %vm391_vm1, %v372_v16, %v363_v19  ;;  %v498_v35 = vpop.permute.xlu0 %497 }
 0x15b   : > { %v380_v13 = vrot.slane %v344_v10, %v360_v6 }
 0x15d   : > { %v381_v17 = vsel %vm362_vm0, %v380_v13, %v376_v14 }
 0x15e   : > { %v350_v18 = vpop.permute.xlu1 %349  ;;  %v394_v23 = vsel %vm393_vm2, %v381_v17, %v392_v21  ;;  %v519_v37 = vpop.permute.xlu0 %518 }
 0x15f   : > { %v389_v20 = vrot.slane %v350_v18, %v360_v6 }
 0x161   : > { %v390_v22 = vsel %vm362_vm0, %v389_v20, %v385_v1 }
 0x162   : > { %v396_v24 = vsel %vm395_vm3, %v390_v22, %v394_v23  ;;  %v409_v27 = vpop.permute.xlu1 %408 }
 0x163   : > { %v399_v25 = vsel %vm398_vm4, %v396_v24, 0.0 }
 0x164   : > { %400 = vadd.xlane.f32.xlu0 %v399_v25 }
 0x166   : > { %v421_v28 = vpop.permute.xlu1 %420 }
 0x16a   : > { %v428_v29 = vpop.permute.xlu1 %427 }
 0x16e   : > { %v477_v30 = vpop.permute.xlu1 %476 }
 0x172   : > { %v484_v32 = vpop.permute.xlu1 %483 }
 0x176   : > { %v435_v33 = vpop.permute.xlu1 %434 }
 0x17a   : > { %525 = vbcast.lane.b32.xlu0 %v523_v26, 256  ;;  %v491_v34 = vpop.permute.xlu1 %490 }
 0x17e   : > { %v442_v36 = vpop.permute.xlu1 %441 }
 0x182   : > { %v449_v38 = vpop.permute.xlu1 %448 }
 0x186   : > { %v505_v44 = vpop.permute.xlu1 %504 }
 0x18a   : > { %v456_v46 = vpop.permute.xlu1 %455 }
 0x18e   : > { %v512_v51 = vpop.permute.xlu1 %511 }
 0x192   : > { %v463_v54 = vpop.permute.xlu1 %462 }
 0x196   : > { %v470_v59 = vpop.permute.xlu1 %469 }
 0x1f1   : > { %v401_v39 = vpop.xlane.xlu0 %400 }
 0x1f2   : > { %v411_v40 = vadd.f32 %v409_v27, %v401_v39 }
 0x1f4   : > { %v412_v41 = vmax.f32 %v411_v40, 0.0 }
 0x1f5   : > { %v526_v60 = vpop.permute.xlu0 %525 }
 0x1f6   : > { %v544_v42 = vmul.f32 %v428_v29, %v412_v41  ;;  %v543_v43 = vmul.f32 %v421_v28, %v412_v41  ;;  %v552_v31 = vmul.f32 %v484_v32, %v412_v41  ;;  %v551_v45 = vmul.f32 %v477_v30, %v412_v41 }
 0x1f7   : > { %v553_v47 = vmul.f32 %v491_v34, %v412_v41  ;;  %v545_v48 = vmul.f32 %v435_v33, %v412_v41  ;;  %v554_v49 = vmul.f32 %v498_v35, %v412_v41  ;;  %v546_v50 = vmul.f32 %v442_v36, %v412_v41 }
 0x1f8   : > { %579 = vperm.xlu0 %919, %v544_v42   ;;  %576 = vperm.xlu1 %918, %v543_v43   ;;  %v555_v52 = vmul.f32 %v505_v44, %v412_v41  ;;  %v547_v53 = vmul.f32 %v449_v38, %v412_v41  ;;  %v556_v55 = vmul.f32 %v512_v51, %v412_v41 }
 0x1f9   : > { %v548_v56 = vmul.f32 %v456_v46, %v412_v41  ;;  %v557_v57 = vmul.f32 %v519_v37, %v412_v41  ;;  %v549_v58 = vmul.f32 %v463_v54, %v412_v41  ;;  %v550_v61 = vmul.f32 %v470_v59, %v412_v41 }
 0x1fa   : > { %v558_v62 = vmul.f32 %v526_v60, %v412_v41 }
 0x1fc   : > { %603 = vperm.xlu0 %919, %v552_v31   ;;  %600 = vperm.xlu1 %918, %v551_v45  }
 0x200   : > { %606 = vperm.xlu0 %919, %v553_v47   ;;  %582 = vperm.xlu1 %918, %v545_v48  }
 0x204   : > { %609 = vperm.xlu0 %919, %v554_v49   ;;  %585 = vperm.xlu1 %918, %v546_v50  }
 0x208   : > { %612 = vperm.xlu0 %919, %v555_v52   ;;  %588 = vperm.xlu1 %918, %v547_v53   ;;  %v857_v52 = vld [vmem:[%s1328_s4] ss:$0 sm:$0xff] }
 0x20c   : > { %615 = vperm.xlu0 %919, %v556_v55   ;;  %591 = vperm.xlu1 %918, %v548_v56  }
 0x210   : > { %618 = vperm.xlu0 %919, %v557_v57   ;;  %594 = vperm.xlu1 %918, %v549_v58  }
 0x214   : > { %597 = vperm.xlu1 %918, %v550_v61   ;;  %621 = vperm.xlu0 %919, %v558_v62  }
 0x277   : > { %v577_v63 = vpop.permute.xlu1 %576  ;;  %v580_v2 = vpop.permute.xlu0 %579 }
 0x278   : > { %v626_v17 = vrot.slane %v577_v63, %v1229_v8  ;;  %v630_v18 = vrot.slane %v580_v2, %v1229_v8 }
 0x27a   : > { %v687_v28 = vsel %vm391_vm1, %v630_v18, %v626_v17 }
 0x27b   : > { %v601_v6 = vpop.permute.xlu1 %600  ;;  %v604_v9 = vpop.permute.xlu0 %603 }
 0x27c   : > { %v658_v19 = vrot.slane %v601_v6, %v1229_v8  ;;  %v662_v1 = vrot.slane %v604_v9, %v1229_v8 }
 0x27e   : > { %v698_v29 = vsel %vm391_vm1, %v662_v1, %v658_v19 }
 0x27f   : > { %v583_v10 = vpop.permute.xlu1 %582  ;;  %v607_v11 = vpop.permute.xlu0 %606 }
 0x280   : > { %v634_v20 = vrot.slane %v583_v10, %v1229_v8  ;;  %v666_v21 = vrot.slane %v607_v11, %v1229_v8 }
 0x282   : > { %v688_v33 = vsel %vm393_vm2, %v634_v20, %v687_v28  ;;  %v699_v34 = vsel %vm393_vm2, %v666_v21, %v698_v29 }
 0x283   : > { %v586_v12 = vpop.permute.xlu1 %585  ;;  %v610_v13 = vpop.permute.xlu0 %609 }
 0x284   : > { %v638_v22 = vrot.slane %v586_v12, %v1229_v8  ;;  %v670_v23 = vrot.slane %v610_v13, %v1229_v8 }
 0x286   : > { %v689_v37 = vsel %vm395_vm3, %v638_v22, %v688_v33  ;;  %v700_v38 = vsel %vm395_vm3, %v670_v23, %v699_v34 }
 0x287   : > { %v589_v14 = vpop.permute.xlu1 %588  ;;  %v613_v15 = vpop.permute.xlu0 %612 }
 0x288   : > { %v642_v24 = vrot.slane %v589_v14, %v1229_v8  ;;  %v674_v25 = vrot.slane %v613_v15, %v1229_v8 }
 0x28a   : > { %v691_v39 = vsel %vm690_vm5, %v642_v24, %v689_v37  ;;  %v701_v40 = vsel %vm690_vm5, %v674_v25, %v700_v38 }
 0x28b   : > { %v592_v0 = vpop.permute.xlu1 %591  ;;  %v616_v16 = vpop.permute.xlu0 %615 }
 0x28c   : > { %v646_v30 = vrot.slane %v592_v0, %v1229_v8  ;;  %v678_v32 = vrot.slane %v616_v16, %v1229_v8 }
 0x28e   : > { %v693_v43 = vsel %vm692_vm6, %v646_v30, %v691_v39  ;;  %v702_v44 = vsel %vm692_vm6, %v678_v32, %v701_v40 }
 0x28f   : > { %v595_v26 = vpop.permute.xlu1 %594  ;;  %v619_v27 = vpop.permute.xlu0 %618 }
 0x290   : > { %v650_v35 = vrot.slane %v595_v26, %v1229_v8  ;;  %v682_v36 = vrot.slane %v619_v27, %v1229_v8 }
 0x292   : > { %v695_v46 = vsel %vm694_vm7, %v650_v35, %v693_v43  ;;  %v703_v47 = vsel %vm694_vm7, %v682_v36, %v702_v44 }
 0x293   : > { %v598_v41 = vpop.permute.xlu1 %597  ;;  %v622_v42 = vpop.permute.xlu0 %621 }
 0x294   : > { %v654_v31 = vrot.slane %v598_v41, %v1229_v8  ;;  %v686_v45 = vrot.slane %v622_v42, %v1229_v8 }
 0x296   : > { %v697_v48 = vsel %vm696_vm8, %v654_v31, %v695_v46  ;;  %v704_v49 = vsel %vm696_vm8, %v686_v45, %v703_v47 }
 0x297   : > { %v708_v50 = vsel %vm707_vm9, %v697_v48, 0.0  ;;  %v711_v51 = vsel %vm707_vm9, %v704_v49, 0.0 }
 0x298   : > { %709 = vadd.xlane.f32.xlu1 %v708_v50  ;;  %712 = vadd.xlane.f32.xlu0 %v711_v51 }
 0x2a9   : > { %724 = vbcast.lane.b32.xlu1 %v857_v52, 264 }
 0x2ae   : > { %720 = vbcast.lane.b32.xlu0 %v857_v52, 256 }
 0x325   : > { %v710_v53 = vpop.xlane.xlu1 %709  ;;  %v713_v54 = vpop.xlane.xlu0 %712 }
 0x329   : > { %v725_v55 = vpop.permute.xlu1 %724  ;;  %v721_v56 = vpop.permute.xlu0 %720 }
 0x32a   : > { %v729_v57 = vadd.f32 %v725_v55, %v713_v54  ;;  %v728_v8 = vadd.f32 %v721_v56, %v710_v53 }
 0x32c   : > { %v859_v58 = vmul.f32 -1.442695, %v729_v57  ;;  %v858_v59 = vmul.f32 -1.442695, %v728_v8 }
 0x32e   : > { %920 = vpow2.f32 %v859_v58 }
 0x32f   : > { %922 = vpow2.f32 %v858_v59 }
 0x338   : > { %v921_v60 = vpop.eup %920 }
 0x339   : > { %v923_v61 = vpop.eup %922  ;;  %v737_v62 = vadd.f32 1.0, %v921_v60 }
 0x33a   : > { %v736_v63 = vadd.f32 1.0, %v923_v61 }
 0x33b   : > { %924 = vrcp.f32 %v737_v62 }
 0x33c   : > { %926 = vrcp.f32 %v736_v63 }
 0x345   : > { %v925_v2 = vpop.eup %924 }
 0x346   : > { %v927_v6 = vpop.eup %926  ;;  %749 = vperm.xlu0 %919, %v925_v2  }
 0x347   : > { %744 = vperm.xlu1 %918, %v927_v6  }
 0x3c5   : > { %v750_v9 = vpop.permute.xlu0 %749 }
 0x3c6   : > { %v745_v10 = vpop.permute.xlu1 %744  ;;  %v754_v11 = vmul.f32 %v750_v9, %v1187_v5  ;;  %v755_v12 = vmul.f32 %v750_v9, %v1191_v7 }
 0x3c7   : > { %v752_v13 = vmul.f32 %v745_v10, %v1183_v3  ;;  %v753_v14 = vmul.f32 %v745_v10, %v1185_v4 }
 0x3c8   : > { %758 = vst [vmem:[%s242_s13 + $0x10] sm:$0xff] %v754_v11  ;;  %759 = vst [vmem:[%s242_s13 + $0x18] sm:$0xff] %v755_v12 }
 0x3c9   : > { %756 = vst [vmem:[%s242_s13] sm:$0xff] %v752_v13  ;;  %757 = vst [vmem:[%s242_s13 + $0x8] sm:$0xff] %v753_v14 }
 0x3ca   : > { %971 = shalt.err (!%p968_p2)
}
 0x3cb   : > { %s972_s8 = scalar_lea.hbm %s1278_s12, 512  ;;  %s976_s10 = scalar_lea.hbm %s1329_s5, 1024 }
 0x3cc   : > { %p973_p4 = scmp.ne.s32.totalorder %s1278_s12, %s972_s8  ;;  %p977_p9 = scmp.lt.u32.totalorder %s1278_s12, %s1329_s5 }
 0x3cd   : > { %p978_p1 = scmp.lt.u32.totalorder %s976_s10, %s972_s8  ;;  %p980_p6 = scmp.lt.u32.totalorder %s972_s8, %s1278_s12 }
 0x3ce   : > { %p974_p5 = pnand %p973_p4, %p1336_p11 }
 0x3cf   : > { %p979_p3 = por %p978_p1, %p977_p9 }
 0x3d0   : > { %p975_p7 = pneg %p974_p5 }
 0x3d1   : > { %p981_p12 = por %p980_p6, %p979_p3 }
 0x3d3   : > { %p982_p13 = pnand %p981_p12, %p975_p7 }
 0x3d5   : > { %985 = shalt.err (!%p982_p13)
}
 0x3d6   : > { %s1031_s26 = smov 256   ;;  %s1032_s28 = smov 16  }
 0x3d7   : > { %869 = dma.vmem_to_hbm [thread:$0]  (%p1336_p11), %s1271_s17, 512, %s1278_s12, %s761_s22, %s1031_s26, %s1031_s26, %s1032_s28  }
 0x3d8 PF: > { %s789_s29 = sand.u32 1, %s1012_s18   ;;  %p1337_p8 = scmp.ne.s32.totalorder %s1334_s6, 0 }
 0x3d9   : > { %p1338_p10 = scmp.ge.s32.totalorder %s1024_s21, 2  ;;  %s790_s25 = scalar_lea.sflag [#allocation4], %s789_s29 }
 0x3db   : > { %p876_p0 = pnand %p1338_p10, %p1337_p8 }
 0x3dd   : > { %1007 = dma.done.wait (!%p876_p0), %s790_s25, 512  }
 0x3de   : > { %1009 = vsyncadd (!%p876_p0), %s790_s25, 4294966784  ;;  %p18_p2 = scmp.ge.s32.totalorder %s1088_s24, 4   ;;  %s1339_s18 = smov %s1016_s19 }
 0x3df   : > { %s1340_s19 = smov %s1020_s20  ;;  %s1341_s20 = smov %s1100_s27 }
 0x3e0   : > { %s1342_s21 = smov %s1088_s24  ;;  %20 = sbr.rel (!%p18_p2) target bundleno = 5 (0x5), region = 85 }
 0x3e7   :  { %795 = vsyncpa [#allocation3], 1 }
 0x3e8   :  { %797 = vsyncpa [#allocation3 + $0x1], 1 }
 0x3e9   :  { %798 = vsyncpa [#allocation4], 1 }
 0x3ea   :  { %800 = vsyncpa [#allocation4 + $0x1], 1 }

</bundles_post_ra>
